<compile_context>
chip_gen: v7x
topology: tpu7x:2x2x1
jax: 0.10.0
libtpu: 0.0.40
codegen_flags: <defaults>
</compile_context>

<pallas_src>
import functools

import jax
import jax.numpy as jnp
from jax import lax
from jax.experimental import pallas as pl
from jax.experimental.pallas import tpu as pltpu


def _kpt_loss_kernel(coef_ref, area_ref, pred_ref, gt_ref, mk_ref, out_ref,
                     *, n_valid, lane_tile, has_tail):
    i = pl.program_id(0)
    f32 = jnp.float32

    # Coordinates arrive as [2, K, TN] (x plane, y plane); cast in VMEM.
    dx = pred_ref[0].astype(f32) - gt_ref[0].astype(f32)       # [K, TN]
    dy = pred_ref[1].astype(f32) - gt_ref[1].astype(f32)
    d = dx * dx + dy * dy

    # e = d / (2*sigmas)^2 / (area + 1e-9) / 2
    #   = d * coef[k] * 1/(area[n] + 1e-9),  coef = 1/(8*sigmas^2)
    inv_area = pl.reciprocal(area_ref[...].astype(f32) + 1e-9,
                             approx=False)                      # [1, TN]
    e = d * (coef_ref[...] * inv_area)                          # [K,1]*[1,TN]

    mk = mk_ref[...].astype(f32)
    term = (1.0 - jnp.exp(-e)) * mk           # single EUP exp per element
    nnz = (mk != 0.0).astype(f32)

    if not has_tail:
        # N is a multiple of the tile: no masking anywhere (static).
        out_ref[0, 0] = jnp.sum(term)
        out_ref[0, 1] = jnp.sum(nnz)
    else:
        last = pl.num_programs(0) - 1

        @pl.when(i != last)
        def _():                              # interior tiles: no mask work
            out_ref[0, 0] = jnp.sum(term)
            out_ref[0, 1] = jnp.sum(nnz)

        @pl.when(i == last)
        def _():                              # tail tile: select out padded lanes
            col = lax.broadcasted_iota(jnp.int32, (1, lane_tile), 1) + i * lane_tile
            valid = col < n_valid             # [1, TN] row, broadcast over K
            # Keep the select (not multiply-by-mask): padded-region garbage may
            # be NaN/Inf and must be discarded, not multiplied by zero.
            out_ref[0, 0] = jnp.sum(jnp.where(valid, term, 0.0))
            out_ref[0, 1] = jnp.sum(jnp.where(valid, nnz, 0.0))


def _num_tensorcores() -> int:
    """Best-effort: 2 for v7x-class chips (2 TCs/chip), else 1."""
    try:
        kind = jax.devices()[0].device_kind.lower()
        if "v7" in kind or "7x" in kind or "tpu7" in kind:
            return 2
    except Exception:
        pass
    return 1


def keypoint_loss(pred_kpts, gt_kpts, kpt_mask, area, sigmas, *, lane_tile=8192):
    """Pallas TPU implementation of ultralytics KeypointLoss.forward.

    pred_kpts, gt_kpts : [N, K, >=2]  (x, y, ...)
    kpt_mask           : [N, K]
    area               : [N, 1] or [N]
    sigmas             : [K]
    Returns a float32 scalar.
    """
    N, K = kpt_mask.shape
    f32 = jnp.float32

    # Lane-dense layout with fused transposes; keep source dtypes (no wrapper
    # upcast — the kernel casts VMEM-resident tiles).
    pred_t = jnp.transpose(pred_kpts[..., :2], (2, 1, 0))   # [2, K, N]
    gt_t = jnp.transpose(gt_kpts[..., :2], (2, 1, 0))       # [2, K, N]
    mk = jnp.transpose(kpt_mask)                            # [K, N]
    if mk.dtype == jnp.bool_:
        mk = mk.astype(jnp.int8)                            # 1 B/elem, no bool refs
    area_row = jnp.reshape(area, (1, N))
    coef = (1.0 / (8.0 * jnp.square(jnp.asarray(sigmas, f32)))).reshape(K, 1)

    # Lane tile: multiple of 128, clamped to the 128-rounded anchor count.
    n_pad = 128 * int(pl.cdiv(N, 128))
    tn = 128 * int(pl.cdiv(max(128, int(lane_tile)), 128))
    tn = min(tn, n_pad)
    # v7x (2 TCs sharing HBM): keep >= 2 parallel grid steps so both cores run.
    if _num_tensorcores() > 1 and n_pad >= 256:
        tn = min(tn, 128 * int(pl.cdiv(N, 256)))
    g = int(pl.cdiv(N, tn))
    has_tail = (g * tn) != N

    kernel = functools.partial(_kpt_loss_kernel, n_valid=N, lane_tile=tn,
                               has_tail=has_tail)

    # Double-buffered VMEM footprint (f32-equivalent upper bound). Only raise
    # the scoped-VMEM limit when the default could be exceeded (v5e: 16 MiB).
    pad_k = 8 * int(pl.cdiv(K, 8))
    est = 2 * (2 * (2 * pad_k * tn * 4) + pad_k * tn * 4 + 8 * tn * 4)
    compiler_kwargs = dict(dimension_semantics=("parallel",))
    if est > 12 * 1024 * 1024:
        compiler_kwargs["vmem_limit_bytes"] = int(min(2 * est, 60 * 1024 * 1024))

    parts = pl.pallas_call(
        kernel,
        out_shape=jax.ShapeDtypeStruct((g, 2), f32),
        grid=(g,),
        in_specs=[
            pl.BlockSpec((K, 1), lambda i: (0, 0)),          # coef  [K, 1]
            pl.BlockSpec((1, tn), lambda i: (0, i)),         # area  [1, N]
            pl.BlockSpec((2, K, tn), lambda i: (0, 0, i)),   # pred  [2, K, N]
            pl.BlockSpec((2, K, tn), lambda i: (0, 0, i)),   # gt    [2, K, N]
            pl.BlockSpec((K, tn), lambda i: (0, i)),         # mask  [K, N]
        ],
        out_specs=pl.BlockSpec((1, 2), lambda i: (i, 0), memory_space=pltpu.SMEM),
        compiler_params=pltpu.CompilerParams(**compiler_kwargs),
    )(coef, area_row, pred_t, gt_t, mk)

    term_sum = jnp.sum(parts[:, 0])
    nnz = jnp.sum(parts[:, 1])
    numel = jnp.asarray(N * K, f32)
    kpt_loss_factor = numel / (nnz + 1e-9)
    return kpt_loss_factor * (term_sum / numel)


class KeypointLoss:
    """Drop-in (forward only) equivalent of the torch module."""

    def __init__(self, sigmas):
        self.sigmas = jnp.asarray(sigmas, jnp.float32)

    def __call__(self, pred_kpts, gt_kpts, kpt_mask, area, **kw):
        return keypoint_loss(pred_kpts, gt_kpts, kpt_mask, area, self.sigmas, **kw)


def _reference(pred_kpts, gt_kpts, kpt_mask, area, sigmas):
    """Pure-JAX mirror of the torch forward (same op order / broadcasting)."""
    d = (pred_kpts[..., 0] - gt_kpts[..., 0]) ** 2 + (pred_kpts[..., 1] - gt_kpts[..., 1]) ** 2
    kpt_loss_factor = (jnp.sum(kpt_mask != 0) + jnp.sum(kpt_mask == 0)) / (
        jnp.sum(kpt_mask != 0) + 1e-9)
    e = d / (2 * sigmas) ** 2 / (area + 1e-9) / 2
    return kpt_loss_factor * jnp.mean((1 - jnp.exp(-e)) * kpt_mask)


if __name__ == "__main__":
    key = jax.random.PRNGKey(0)
    k1, k2, k3, k4 = jax.random.split(key, 4)

    # Small deterministic shapes: 200 matched anchors, 17 COCO keypoints.
    # N=200 is NOT a multiple of the lane tile -> exercises the tail-mask path.
    N, K = 200, 17
    sigmas = jnp.array([.26, .25, .25, .35, .35, .79, .79, .72, .72, .62, .62,
                        1.07, 1.07, .87, .87, .89, .89], jnp.float32) / 10.0

    gt_xy = jax.random.uniform(k1, (N, K, 2), jnp.float32, 0.0, 64.0)
    gt_kpts = jnp.concatenate([gt_xy, jnp.ones((N, K, 1), jnp.float32)], axis=-1)
    pred_kpts = gt_kpts.at[..., :2].add(
        2.0 * jax.random.normal(k2, (N, K, 2), jnp.float32))
    kpt_mask = (jax.random.uniform(k3, (N, K)) > 0.3).astype(jnp.float32)
    area = jax.random.uniform(k4, (N, 1), jnp.float32, 500.0, 2000.0)

    loss_mod = KeypointLoss(sigmas)

    # Default tile (single partial block) and a small tile (multi-step grid
    # with interior + masked-tail tiles) — both must match the reference.
    loss = jax.block_until_ready(loss_mod(pred_kpts, gt_kpts, kpt_mask, area))
    loss_small = jax.block_until_ready(
        loss_mod(pred_kpts, gt_kpts, kpt_mask, area, lane_tile=128))

    ref = _reference(pred_kpts, gt_kpts, kpt_mask, area, sigmas)
    assert jnp.allclose(loss, ref, rtol=2e-5, atol=1e-6), (loss, ref)
    assert jnp.allclose(loss_small, ref, rtol=2e-5, atol=1e-6), (loss_small, ref)
    print("KERNEL_OK")
</pallas_src>

<mosaic_0001>
module attributes {stable_mosaic.version = 11 : i64} {
  func.func @_kpt_loss_kernel(%arg0: i32, %arg1: memref<17x1xf32, #tpu.memory_space<vmem>>, %arg2: memref<1x256xf32, #tpu.memory_space<vmem>>, %arg3: memref<2x17x256xf32, #tpu.memory_space<vmem>>, %arg4: memref<2x17x256xf32, #tpu.memory_space<vmem>>, %arg5: memref<17x256xf32, #tpu.memory_space<vmem>>, %arg6: memref<1x2xf32, #tpu.memory_space<smem>>) attributes {dimension_semantics = [#tpu.dimension_semantics<parallel>], iteration_bounds = array<i64: 1>, scalar_prefetch = 0 : i64, scratch_operands = 0 : i64, tpu.core_type = #tpu.core_type<tc>, window_params = [{pipeline_mode = #tpu.pipeline_mode<synchronous>, transform_indices = @transform_0, window_bounds = array<i64: 17, 1>}, {transform_indices = @transform_1, window_bounds = array<i64: 1, 256>}, {transform_indices = @transform_2, window_bounds = array<i64: 2, 17, 256>}, {transform_indices = @transform_3, window_bounds = array<i64: 2, 17, 256>}, {transform_indices = @transform_4, window_bounds = array<i64: 17, 256>}, {transform_indices = @transform_5, window_bounds = array<i64: 1, 2>}]} {
    %c0 = arith.constant 0 : index
    %c0_0 = arith.constant 0 : index
    %c0_1 = arith.constant 0 : index
    %0 = vector.load %arg3[%c0, %c0_0, %c0_1] : memref<2x17x256xf32, #tpu.memory_space<vmem>>, vector<1x17x256xf32>
    %1 = vector.shape_cast %0 : vector<1x17x256xf32> to vector<17x256xf32>
    %c0_2 = arith.constant 0 : index
    %c0_3 = arith.constant 0 : index
    %c0_4 = arith.constant 0 : index
    %2 = vector.load %arg4[%c0_2, %c0_3, %c0_4] : memref<2x17x256xf32, #tpu.memory_space<vmem>>, vector<1x17x256xf32>
    %3 = vector.shape_cast %2 : vector<1x17x256xf32> to vector<17x256xf32>
    %4 = arith.subf %1, %3 : vector<17x256xf32>
    %c1 = arith.constant 1 : index
    %c0_5 = arith.constant 0 : index
    %c0_6 = arith.constant 0 : index
    %5 = vector.load %arg3[%c1, %c0_5, %c0_6] : memref<2x17x256xf32, #tpu.memory_space<vmem>>, vector<1x17x256xf32>
    %6 = vector.shape_cast %5 : vector<1x17x256xf32> to vector<17x256xf32>
    %c1_7 = arith.constant 1 : index
    %c0_8 = arith.constant 0 : index
    %c0_9 = arith.constant 0 : index
    %7 = vector.load %arg4[%c1_7, %c0_8, %c0_9] : memref<2x17x256xf32, #tpu.memory_space<vmem>>, vector<1x17x256xf32>
    %8 = vector.shape_cast %7 : vector<1x17x256xf32> to vector<17x256xf32>
    %9 = arith.subf %6, %8 : vector<17x256xf32>
    %10 = arith.mulf %4, %4 : vector<17x256xf32>
    %11 = arith.mulf %9, %9 : vector<17x256xf32>
    %12 = arith.addf %10, %11 : vector<17x256xf32>
    %c0_10 = arith.constant 0 : index
    %c0_11 = arith.constant 0 : index
    %13 = vector.load %arg2[%c0_10, %c0_11] : memref<1x256xf32, #tpu.memory_space<vmem>>, vector<1x256xf32>
    %cst = arith.constant 9.99999971E-10 : f32
    %14 = vector.broadcast %cst : f32 to vector<1x256xf32>
    %15 = arith.addf %13, %14 : vector<1x256xf32>
    %16 = tpu.reciprocal %15 : vector<1x256xf32> -> vector<1x256xf32>
    %c0_12 = arith.constant 0 : index
    %c0_13 = arith.constant 0 : index
    %17 = vector.load %arg1[%c0_12, %c0_13] : memref<17x1xf32, #tpu.memory_space<vmem>>, vector<17x1xf32>
    %18 = vector.broadcast %17 : vector<17x1xf32> to vector<17x256xf32>
    %19 = vector.broadcast %16 : vector<1x256xf32> to vector<17x256xf32>
    %20 = arith.mulf %18, %19 : vector<17x256xf32>
    %21 = arith.mulf %12, %20 : vector<17x256xf32>
    %c0_14 = arith.constant 0 : index
    %c0_15 = arith.constant 0 : index
    %22 = vector.load %arg5[%c0_14, %c0_15] : memref<17x256xf32, #tpu.memory_space<vmem>>, vector<17x256xf32>
    %cst_16 = arith.constant 0.000000e+00 : f32
    %23 = vector.broadcast %cst_16 : f32 to vector<17x256xf32>
    %24 = arith.subf %23, %21 : vector<17x256xf32>
    %25 = math.exp %24 : vector<17x256xf32>
    %cst_17 = arith.constant 1.000000e+00 : f32
    %26 = vector.broadcast %cst_17 : f32 to vector<17x256xf32>
    %27 = arith.subf %26, %25 : vector<17x256xf32>
    %28 = arith.mulf %27, %22 : vector<17x256xf32>
    %cst_18 = arith.constant 0.000000e+00 : f32
    %29 = vector.broadcast %cst_18 : f32 to vector<17x256xf32>
    %30 = arith.cmpf one, %22, %29 : vector<17x256xf32>
    %31 = arith.extui %30 : vector<17x256xi1> to vector<17x256xi32>
    %32 = arith.sitofp %31 : vector<17x256xi32> to vector<17x256xf32>
    %c0_i32 = arith.constant 0 : i32
    %33 = arith.cmpi ne, %arg0, %c0_i32 : i32
    %34 = arith.extui %33 : i1 to i32
    %c0_i32_19 = arith.constant 0 : i32
    %35 = arith.cmpi ne, %34, %c0_i32_19 : i32
    scf.if %35 {
      %39 = vector.shape_cast %28 : vector<17x256xf32> to vector<1x17x256xf32>
      %cst_22 = arith.constant dense<0.000000e+00> : vector<1xf32>
      %40 = vector.multi_reduction <add>, %39, %cst_22 [1, 2] : vector<1x17x256xf32> to vector<1xf32>
      %41 = vector.shape_cast %40 : vector<1xf32> to vector<1x1x1xf32>
      %42 = vector.extract %41[0, 0, 0] : f32 from vector<1x1x1xf32>
      %c0_23 = arith.constant 0 : index
      %c0_24 = arith.constant 0 : index
      %43 = memref.load %arg6[%c0_23, %c0_24] : memref<1x2xf32, #tpu.memory_space<smem>>
      memref.store %42, %arg6[%c0_23, %c0_24] : memref<1x2xf32, #tpu.memory_space<smem>>
      %44 = vector.shape_cast %32 : vector<17x256xf32> to vector<1x17x256xf32>
      %cst_25 = arith.constant dense<0.000000e+00> : vector<1xf32>
      %45 = vector.multi_reduction <add>, %44, %cst_25 [1, 2] : vector<1x17x256xf32> to vector<1xf32>
      %46 = vector.shape_cast %45 : vector<1xf32> to vector<1x1x1xf32>
      %47 = vector.extract %46[0, 0, 0] : f32 from vector<1x1x1xf32>
      %c0_26 = arith.constant 0 : index
      %c1_27 = arith.constant 1 : index
      %48 = memref.load %arg6[%c0_26, %c1_27] : memref<1x2xf32, #tpu.memory_space<smem>>
      memref.store %47, %arg6[%c0_26, %c1_27] : memref<1x2xf32, #tpu.memory_space<smem>>
    } else {
    }
    %c0_i32_20 = arith.constant 0 : i32
    %36 = arith.cmpi eq, %arg0, %c0_i32_20 : i32
    %37 = arith.extui %36 : i1 to i32
    %c0_i32_21 = arith.constant 0 : i32
    %38 = arith.cmpi ne, %37, %c0_i32_21 : i32
    scf.if %38 {
      %39 = tpu.iota {dimensions = array<i32: 1>} : vector<1x256xi32>
      %c256_i32 = arith.constant 256 : i32
      %40 = arith.muli %arg0, %c256_i32 : i32
      %41 = vector.broadcast %40 : i32 to vector<1x256xi32>
      %42 = arith.addi %39, %41 : vector<1x256xi32>
      %c200_i32 = arith.constant 200 : i32
      %43 = vector.broadcast %c200_i32 : i32 to vector<1x256xi32>
      %44 = arith.cmpi slt, %42, %43 : vector<1x256xi32>
      %cst_22 = arith.constant 0.000000e+00 : f32
      %45 = vector.shape_cast %44 : vector<1x256xi1> to vector<1x256xi1>
      %46 = vector.broadcast %45 : vector<1x256xi1> to vector<17x256xi1>
      %47 = vector.broadcast %cst_22 : f32 to vector<17x256xf32>
      %48 = arith.select %46, %28, %47 : vector<17x256xi1>, vector<17x256xf32>
      %49 = vector.shape_cast %48 : vector<17x256xf32> to vector<1x17x256xf32>
      %cst_23 = arith.constant dense<0.000000e+00> : vector<1xf32>
      %50 = vector.multi_reduction <add>, %49, %cst_23 [1, 2] : vector<1x17x256xf32> to vector<1xf32>
      %51 = vector.shape_cast %50 : vector<1xf32> to vector<1x1x1xf32>
      %52 = vector.extract %51[0, 0, 0] : f32 from vector<1x1x1xf32>
      %c0_24 = arith.constant 0 : index
      %c0_25 = arith.constant 0 : index
      %53 = memref.load %arg6[%c0_24, %c0_25] : memref<1x2xf32, #tpu.memory_space<smem>>
      memref.store %52, %arg6[%c0_24, %c0_25] : memref<1x2xf32, #tpu.memory_space<smem>>
      %cst_26 = arith.constant 0.000000e+00 : f32
      %54 = vector.shape_cast %44 : vector<1x256xi1> to vector<1x256xi1>
      %55 = vector.broadcast %54 : vector<1x256xi1> to vector<17x256xi1>
      %56 = vector.broadcast %cst_26 : f32 to vector<17x256xf32>
      %57 = arith.select %55, %32, %56 : vector<17x256xi1>, vector<17x256xf32>
      %58 = vector.shape_cast %57 : vector<17x256xf32> to vector<1x17x256xf32>
      %cst_27 = arith.constant dense<0.000000e+00> : vector<1xf32>
      %59 = vector.multi_reduction <add>, %58, %cst_27 [1, 2] : vector<1x17x256xf32> to vector<1xf32>
      %60 = vector.shape_cast %59 : vector<1xf32> to vector<1x1x1xf32>
      %61 = vector.extract %60[0, 0, 0] : f32 from vector<1x1x1xf32>
      %c0_28 = arith.constant 0 : index
      %c1_29 = arith.constant 1 : index
      %62 = memref.load %arg6[%c0_28, %c1_29] : memref<1x2xf32, #tpu.memory_space<smem>>
      memref.store %61, %arg6[%c0_28, %c1_29] : memref<1x2xf32, #tpu.memory_space<smem>>
    } else {
    }
    return
  }
  func.func @transform_0(%arg0: i32) -> (i32, i32) {
    %c0_i32 = arith.constant 0 : i32
    %c0_i32_0 = arith.constant 0 : i32
    %c0_i32_1 = arith.constant 0 : i32
    return %c0_i32, %c0_i32_0 : i32, i32
  }
  func.func @transform_1(%arg0: i32) -> (i32, i32) {
    %c0_i32 = arith.constant 0 : i32
    %c0_i32_0 = arith.constant 0 : i32
    return %c0_i32, %arg0 : i32, i32
  }
  func.func @transform_2(%arg0: i32) -> (i32, i32, i32) {
    %c0_i32 = arith.constant 0 : i32
    %c0_i32_0 = arith.constant 0 : i32
    %c0_i32_1 = arith.constant 0 : i32
    return %c0_i32, %c0_i32_0, %arg0 : i32, i32, i32
  }
  func.func @transform_3(%arg0: i32) -> (i32, i32, i32) {
    %c0_i32 = arith.constant 0 : i32
    %c0_i32_0 = arith.constant 0 : i32
    %c0_i32_1 = arith.constant 0 : i32
    return %c0_i32, %c0_i32_0, %arg0 : i32, i32, i32
  }
  func.func @transform_4(%arg0: i32) -> (i32, i32) {
    %c0_i32 = arith.constant 0 : i32
    %c0_i32_0 = arith.constant 0 : i32
    return %c0_i32, %arg0 : i32, i32
  }
  func.func @transform_5(%arg0: i32) -> (i32, i32) {
    %c0_i32 = arith.constant 0 : i32
    %c0_i32_0 = arith.constant 0 : i32
    return %arg0, %c0_i32 : i32, i32
  }
}

</mosaic_0001>

<bundles_post_ra>
// kernel: tpu_custom_call.1
= control target key start
LH: loop header
LB: loop body
LE: loop exit
PB: predicated region body
PF: predicated region fallthrough
CT: control target
= control target key end

     0   :  { %v348_v2 = vmov 0   ;;  %s538_s0 = inlined_call_operand.vmem [shape: f32[17,1], index: 0, kind: input, shape index: {}]   ;;  %s539_s1 = inlined_call_operand.vmem [shape: f32[1,200], index: 1, kind: input, shape index: {}]   ;;  %s540_s2 = inlined_call_operand.vmem [shape: f32[2,17,200], index: 2, kind: input, shape index: {}]   ;;  %s541_s3 = inlined_call_operand.vmem [shape: f32[2,17,200], index: 3, kind: input, shape index: {}]   ;;  %s542_s4 = inlined_call_operand.vmem [shape: f32[17,200], index: 4, kind: input, shape index: {}]   ;;  %s543_s5 = inlined_call_operand.hbm [shape: f32[1,2], index: 5, kind: output, shape index: {}]  }
   0x1   :  { %v80_v0 = vld [vmem:[%s538_s0] sm:$0xff]  ;;  %v82_v1 = vld [vmem:[%s538_s0 + $0x10] sm:$0x1]  ;;  %320 = vset.pattern.permute.xlu0 %v348_v2  ;;  %321 = vset.pattern.permute.xlu1 %v348_v2  ;;  %v81_v3 = vld [vmem:[%s538_s0 + $0x8] sm:$0xff] }
   0x2   :  { %85 = vperm.xlu0 %320, %v80_v0   ;;  %95 = vperm.xlu1 %321, %v82_v1  }
   0x6   :  { %90 = vperm.xlu0 %320, %v81_v3  }
   0x7   :  { %10 = vsyncpa [#allocation3], 0  ;;  %v99_v4 = vlaneseq  ;;  %v393_v5 = vld [vmem:[%s542_s4 + $0x8] sm:$0xff]  ;;  %v398_v7 = vld [vmem:[%s542_s4] sm:$0xff]  ;;  %v349_v9 = vmov 0.0   ;;  %vm242_vm7 = vcmask 1040384  }
   0x8   :  { %vm158_vm0 = vcmp.ne.f32.partialorder %v393_v5, 0.0  ;;  %vm157_vm1 = vcmp.ne.f32.partialorder %v398_v7, 0.0  ;;  %v408_v11 = vld [vmem:[%s542_s4 + $0x10] sm:$0xff]  ;;  %v415_v14 = vld [vmem:[%s542_s4 + $0x18] sm:$0xff]  ;;  %v422_v17 = vld [vmem:[%s542_s4 + $0x20] sm:$0x1] }
   0x9   :  { %v221_v6 = vand.u32 127, %v99_v4  ;;  %v308_v10 = vsel %vm158_vm0, 1.0, %v349_v9  ;;  %v307_v12 = vsel %vm157_vm1, 1.0, %v349_v9  ;;  %vm159_vm3 = vcmp.ne.f32.partialorder %v408_v11, 0.0  ;;  %v427_v20 = vld [vmem:[%s542_s4 + $0x28] sm:$0x1] }
   0xa   :  { %vm160_vm4 = vcmp.ne.f32.partialorder %v415_v14, 0.0  ;;  %v309_v16 = vsel %vm159_vm3, 1.0, %v349_v9  ;;  %vm161_vm5 = vcmp.ne.f32.partialorder %v422_v17, 0.0  ;;  %vm162_vm6 = vcmp.ne.f32.partialorder %v427_v20, 0.0  ;;  %v77_v30 = vld [vmem:[%s539_s1] sm:$0x3] }
   0xb   :  { %v401_v8 = vadd.s32 128, %v221_v6  ;;  %v310_v18 = vsel %vm160_vm4, 1.0, %v349_v9  ;;  %v311_v22 = vsel %vm161_vm5, 1.0, %v349_v9  ;;  %v312_v24 = vsel %vm162_vm6, 1.0, %v349_v9  ;;  %v21_v32 = vld [vmem:[%s540_s2] sm:$0xff]  ;;  %v22_v33 = vld [vmem:[%s540_s2 + $0x8] sm:$0xff] }
   0xc   :  { %v267_v25 = vsel %vm242_vm7, %v311_v22, 0.0  ;;  %v78_v31 = vadd.f32 1e-09, %v77_v30  ;;  %v27_v34 = vld [vmem:[%s541_s3] sm:$0xff]  ;;  %v28_v35 = vld [vmem:[%s541_s3 + $0x8] sm:$0xff]  ;;  %v295_v36 = vld [vmem:[%s540_s2 + $0x30] sm:$0xff] }
   0xd   :  { %vm228_vm2 = vcmp.lt.s32.totalorder %v401_v8, 200  ;;  %v296_v37 = vld [vmem:[%s540_s2 + $0x38] sm:$0xff]  ;;  %v301_v38 = vld [vmem:[%s541_s3 + $0x30] sm:$0xff]  ;;  %v100_v39 = vshrl.u32 %v99_v4, 7  ;;  %v25_v41 = vld [vmem:[%s540_s2 + $0x20] sm:$0x1]  ;;  %v33_v49 = vsub.f32 %v21_v32, %v27_v34  ;;  %v34_v50 = vsub.f32 %v22_v33, %v28_v35 }
   0xe   :  { %v259_v13 = vsel %vm228_vm2, %v308_v10, 0.0  ;;  %v261_v21 = vsel %vm228_vm2, %v310_v18, 0.0  ;;  %v263_v26 = vsel %vm228_vm2, %v312_v24, 0.0  ;;  %322 = vrcp.f32 %v78_v31  ;;  %v302_v40 = vld [vmem:[%s541_s3 + $0x38] sm:$0xff]  ;;  %v26_v42 = vld [vmem:[%s540_s2 + $0x28] sm:$0x1] }
   0xf   :  { %v264_v15 = vadd.f32 %v307_v12, %v259_v13  ;;  %v269_v28 = vsel %vm242_vm7, %v263_v26, 0.0  ;;  %v31_v43 = vld [vmem:[%s541_s3 + $0x20] sm:$0x1]  ;;  %v32_v44 = vld [vmem:[%s541_s3 + $0x28] sm:$0x1]  ;;  %v53_v51 = vsub.f32 %v295_v36, %v301_v38  ;;  %v23_v52 = vld [vmem:[%s540_s2 + $0x10] sm:$0xff]  ;;  %v54_v54 = vsub.f32 %v296_v37, %v302_v40 }
  0x10   :  { %v299_v45 = vld [vmem:[%s540_s2 + $0x50] sm:$0x1]  ;;  %v300_v46 = vld [vmem:[%s540_s2 + $0x58] sm:$0x1]  ;;  %v297_v57 = vld [vmem:[%s540_s2 + $0x40] sm:$0xff]  ;;  %v37_v61 = vsub.f32 %v25_v41, %v31_v43  ;;  %v38_v62 = vsub.f32 %v26_v42, %v32_v44  ;;  %v101_v1 = vsub.s32 0, %v100_v39  ;;  %v59_v3 = vmul.f32 %v33_v49, %v33_v49 }
  0x11   :  { %v265_v19 = vadd.f32 %v309_v16, %v264_v15  ;;  %v305_v47 = vld [vmem:[%s541_s3 + $0x50] sm:$0x1]  ;;  %v306_v48 = vld [vmem:[%s541_s3 + $0x58] sm:$0x1]  ;;  %v298_v58 = vld [vmem:[%s540_s2 + $0x48] sm:$0xff]  ;;  %v105_v2 = vsub.s32 1, %v100_v39  ;;  %v60_v4 = vmul.f32 %v34_v50, %v34_v50  ;;  %v65_v6 = vmul.f32 %v53_v51, %v53_v51 }
  0x12   :  { %v24_v53 = vld [vmem:[%s540_s2 + $0x18] sm:$0xff]  ;;  %v29_v55 = vld [vmem:[%s541_s3 + $0x10] sm:$0xff]  ;;  %v303_v59 = vld [vmem:[%s541_s3 + $0x40] sm:$0xff]  ;;  %v57_v63 = vsub.f32 %v299_v45, %v305_v47  ;;  %v58_v0 = vsub.f32 %v300_v46, %v306_v48  ;;  %v66_v12 = vmul.f32 %v54_v54, %v54_v54  ;;  %v63_v18 = vmul.f32 %v37_v61, %v37_v61  ;;  %s336_s6 = scalar_lea.hbm %s543_s5, 16 }
  0x13   :  { %v266_v23 = vadd.f32 %v265_v19, %v261_v21  ;;  %v30_v56 = vld [vmem:[%s541_s3 + $0x18] sm:$0xff]  ;;  %v304_v60 = vld [vmem:[%s541_s3 + $0x48] sm:$0xff]  ;;  %v35_v9 = vsub.f32 %v23_v52, %v29_v55  ;;  %v55_v15 = vsub.f32 %v297_v57, %v303_v59  ;;  %v64_v19 = vmul.f32 %v38_v62, %v38_v62  ;;  %p337_p0 = scmp.ne.s32.totalorder %s543_s5, %s336_s6  ;;  %p340_p1 = scmp.lt.u32.totalorder %s336_s6, %s543_s5 }
  0x14   :  { %v36_v13 = vsub.f32 %v24_v53, %v30_v56  ;;  %v56_v16 = vsub.f32 %v298_v58, %v304_v60  ;;  %v69_v21 = vmul.f32 %v57_v63, %v57_v63  ;;  %v70_v22 = vmul.f32 %v58_v0, %v58_v0 }
  0x15   :  { %v268_v27 = vadd.f32 %v267_v25, %v266_v23  ;;  %v61_v25 = vmul.f32 %v35_v9, %v35_v9  ;;  %v72_v30 = vadd.f32 %v66_v12, %v60_v4  ;;  %p342_p2 = pnand %p340_p1, %p337_p0 }
  0x16   :  { %v62_v26 = vmul.f32 %v36_v13, %v36_v13  ;;  %v75_v31 = vadd.f32 %v69_v21, %v63_v18  ;;  %v76_v32 = vadd.f32 %v70_v22, %v64_v19 }
  0x17   :  { %v270_v29 = vadd.f32 %v269_v28, %v268_v27  ;;  %v67_v27 = vmul.f32 %v55_v15, %v55_v15  ;;  %v68_v28 = vmul.f32 %v56_v16, %v56_v16 }
  0x18   :  { %v323_v10 = vpop.eup %322 }
  0x19   :  { %v102_v23 = vrot.slane %v323_v10, %v101_v1  ;;  %v106_v24 = vrot.slane %v323_v10, %v105_v2  ;;  %v73_v39 = vadd.f32 %v67_v27, %v61_v25  ;;  %v74_v40 = vadd.f32 %v68_v28, %v62_v26 }
  0x25   :  { %271 = vadd.xlane.f32.xlu0 %v270_v29  ;;  %v71_v29 = vadd.f32 %v65_v6, %v59_v3 }
  0x81   :  { %v86_v33 = vpop.permute.xlu0 %85  ;;  %v96_v34 = vpop.permute.xlu1 %95 }
  0x82   :  { %v109_v35 = vmul.f32 %v102_v23, %v86_v33  ;;  %v110_v36 = vmul.f32 %v106_v24, %v86_v33  ;;  %v113_v37 = vmul.f32 %v102_v23, %v96_v34  ;;  %v114_v38 = vmul.f32 %v106_v24, %v96_v34 }
  0x84   :  { %v115_v41 = vmul.f32 %v109_v35, %v71_v29  ;;  %v116_v42 = vmul.f32 %v110_v36, %v72_v30  ;;  %v119_v43 = vmul.f32 %v113_v37, %v75_v31  ;;  %v120_v44 = vmul.f32 %v114_v38, %v76_v32 }
  0x85   :  { %v91_v45 = vpop.permute.xlu0 %90 }
  0x86   :  { %v127_v46 = vsub.f32 0.0, %v115_v41  ;;  %v128_v47 = vsub.f32 0.0, %v116_v42  ;;  %v111_v48 = vmul.f32 %v102_v23, %v91_v45  ;;  %v112_v49 = vmul.f32 %v106_v24, %v91_v45 }
  0x87   :  { %v131_v50 = vsub.f32 0.0, %v119_v43  ;;  %v132_v51 = vsub.f32 0.0, %v120_v44 }
  0x88   :  { %v133_v52 = vmul.f32 1.442695, %v127_v46  ;;  %v135_v53 = vmul.f32 1.442695, %v128_v47  ;;  %v117_v54 = vmul.f32 %v111_v48, %v73_v39  ;;  %v118_v55 = vmul.f32 %v112_v49, %v74_v40 }
  0x89   :  { %v141_v56 = vmul.f32 1.442695, %v131_v50  ;;  %v143_v57 = vmul.f32 1.442695, %v132_v51 }
  0x8a   :  { %324 = vpow2.f32 %v133_v52  ;;  %v129_v58 = vsub.f32 0.0, %v117_v54  ;;  %v130_v59 = vsub.f32 0.0, %v118_v55 }
  0x8b   :  { %326 = vpow2.f32 %v135_v53 }
  0x8c   :  { %v137_v60 = vmul.f32 1.442695, %v129_v58  ;;  %v139_v61 = vmul.f32 1.442695, %v130_v59  ;;  %328 = vpow2.f32 %v141_v56 }
  0x8d   :  { %330 = vpow2.f32 %v143_v57 }
  0x8e   :  { %332 = vpow2.f32 %v137_v60 }
  0x8f   :  { %334 = vpow2.f32 %v139_v61 }
  0x94   :  { %v325_v62 = vpop.eup %324 }
  0x95   :  { %v327_v63 = vpop.eup %326  ;;  %v145_v0 = vsub.f32 1.0, %v325_v62 }
  0x96   :  { %v329_v1 = vpop.eup %328  ;;  %v146_v2 = vsub.f32 1.0, %v327_v63 }
  0x97   :  { %v331_v3 = vpop.eup %330  ;;  %v151_v4 = vmul.f32 %v145_v0, %v398_v7  ;;  %v149_v6 = vsub.f32 1.0, %v329_v1 }
  0x98   :  { %v333_v9 = vpop.eup %332  ;;  %v152_v10 = vmul.f32 %v146_v2, %v393_v5  ;;  %v150_v12 = vsub.f32 1.0, %v331_v3 }
  0x99   :  { %v335_v13 = vpop.eup %334  ;;  %v147_v15 = vsub.f32 1.0, %v333_v9  ;;  %v155_v18 = vmul.f32 %v149_v6, %v422_v17 }
  0x9a   :  { %v148_v16 = vsub.f32 1.0, %v335_v13  ;;  %v156_v19 = vmul.f32 %v150_v12, %v427_v20  ;;  %v234_v21 = vsel %vm228_vm2, %v152_v10, 0.0 }
  0x9b   :  { %v153_v22 = vmul.f32 %v147_v15, %v408_v11  ;;  %v239_v23 = vadd.f32 %v234_v21, %v151_v4  ;;  %v243_v26 = vsel %vm242_vm7, %v155_v18, 0.0 }
  0x9c   :  { %v154_v7 = vmul.f32 %v148_v16, %v415_v14  ;;  %v238_v24 = vsel %vm228_vm2, %v156_v19, 0.0 }
  0x9d   :  { %v240_v5 = vadd.f32 %v239_v23, %v153_v22  ;;  %v245_v20 = vsel %vm242_vm7, %v238_v24, 0.0 }
  0x9e   :  { %v236_v25 = vsel %vm228_vm2, %v154_v7, 0.0 }
  0x9f   :  { %v241_v17 = vadd.f32 %v240_v5, %v236_v25 }
  0xa1   :  { %v244_v27 = vadd.f32 %v243_v26, %v241_v17 }
  0xa3   :  { %v246_v28 = vadd.f32 %v245_v20, %v244_v27 }
  0xa5   :  { %247 = vadd.xlane.f32.xlu1 %v246_v28 }
  0xb2   :  { %v272_v29 = vpop.xlane.xlu0 %271 }
  0xb3   :  { %v273_v11 = vrot.slane %v272_v29, 4 }
  0xb5   :  { %v274_v30 = vadd.f32 %v273_v11, %v272_v29 }
  0xb7   :  { %v275_v31 = vrot.slane %v274_v30, 2 }
  0xb9   :  { %v276_v34 = vadd.f32 %v275_v31, %v274_v30 }
  0xbb   :  { %v277_v8 = vrot.slane %v276_v34, 1 }
  0xbd   :  { %v278_v39 = vadd.f32 %v277_v8, %v276_v34 }
 0x132   :  { %v248_v14 = vpop.xlane.xlu1 %247 }
 0x133   :  { %v249_v32 = vrot.slane %v248_v14, 4 }
 0x135   :  { %v250_v33 = vadd.f32 %v249_v32, %v248_v14 }
 0x137   :  { %v251_v35 = vrot.slane %v250_v33, 2 }
 0x139   :  { %v252_v36 = vadd.f32 %v251_v35, %v250_v33 }
 0x13b   :  { %v253_v37 = vrot.slane %v252_v36, 1 }
 0x13d   :  { %v254_v38 = vadd.f32 %v253_v37, %v252_v36 }
 0x13f   :  { %313 = vpush %v254_v38 }
 0x140   :  { %315 = vpush %v278_v39 }
 0x170   :  { %s314_s2 = spop %313 }
 0x171   :  { %257 = sst [smem:[#allocation2]] %s314_s2  ;;  %s316_s3 = spop %315 }
 0x172   :  { %281 = sst [smem:[#allocation2 + $0x1]] %s316_s3 }
 0x173   :  { %345 = shalt.err (!%p342_p2)
}
 0x174   :  { %s350_s10 = smov [#allocation2]  }
 0x175   :  { %289 = dma.smem_to_hbm %s350_s10, 16, %s543_s5, [#allocation3]  }
 0x176   :  { %346 = dma.done.wait [#allocation3], 16  }
 0x177   :  { %347 = vsyncadd [#allocation3], 4294967280 }
 0x178   :  { %293 = sfence }
 0x179   :  { %294 = vsyncpa [#allocation3], 1 }

</bundles_post_ra>
